<compile_context>
chip_gen: v6e
topology: v6e:2x2x1
jax: 0.10.0
libtpu: 0.0.40
codegen_flags: <defaults>
</compile_context>

<pallas_src>
import jax
import jax.numpy as jnp
from jax.experimental import pallas as pl
from jax.experimental.pallas import tpu as pltpu

HIDDEN = 128
LANES = 128            # pad the action dim to a full lane width for the MXU / softmax
NEG_BIG = -1e30        # padded-logit bias -> exp underflows to exactly 0


def _round_up(v, m):
    return ((v + m - 1) // m) * m


def _tile_budget():
    """(max_batch_tile, vmem_limit_bytes), adapted to the chip generation."""
    try:
        vmem_bytes = pltpu.get_tpu_info().vmem_capacity_bytes
    except Exception:
        vmem_bytes = 64 * 1024 * 1024
    if vmem_bytes >= 128 * 1024 * 1024:          # v5e / v6e: 128 MiB physical VMEM
        return 4096, 64 * 1024 * 1024
    return 2048, 32 * 1024 * 1024                # v7x: 64 MiB physical VMEM


def actor_kernel(x_ref, w1_ref, b1_ref, w2_ref, b2_ref, o_ref):
    a = o_ref.shape[-1]                                    # real action count

    # ---- Layer 1 on the MXU (K = state_size is tiny; padding is free because
    # the MXU is otherwise idle).  bf16 inputs, f32 accumulation.
    h = jnp.dot(x_ref[...].astype(jnp.bfloat16), w1_ref[...],
                preferred_element_type=jnp.float32) + b1_ref[...]
    h = jnp.maximum(h, 0.0)

    # ---- Layer 2 on the MXU, lane-dense N = 128 (zero weight columns plus
    # -1e30 bias columns so the padded logits vanish under softmax).
    logits = jnp.dot(h.astype(w2_ref.dtype), w2_ref[...],
                     preferred_element_type=jnp.float32) + b2_ref[...]

    # ---- Numerically stable softmax over the padded lane width; padded
    # columns exp to exactly 0.  Exact division keeps rows summing to 1.
    m = jnp.max(logits, axis=-1, keepdims=True)
    e = jnp.exp(logits - m)
    probs = e / jnp.sum(e, axis=-1, keepdims=True)

    # Narrow store: only the real action columns go back to HBM.
    o_ref[...] = probs[:, :a].astype(o_ref.dtype)


@jax.jit
def actor_forward(x, w1, b1, w2, b2):
    B, S = x.shape
    A = w2.shape[1]
    A_pad = _round_up(A, LANES)
    max_tb, vmem_limit = _tile_budget()

    # Lane-dense padding of the output head (cheap, hoisted under jit).
    w1b = w1.astype(jnp.bfloat16)
    w2p = jnp.zeros((HIDDEN, A_pad), jnp.bfloat16).at[:, :A].set(w2.astype(jnp.bfloat16))
    b2p = jnp.full((1, A_pad), NEG_BIG, jnp.float32).at[:, :A].set(b2.astype(jnp.float32))

    # Balanced batch tiling; prefer >= 2 grid steps so both v7x TCs get work.
    min_tiles = min(2, pl.cdiv(B, 8))
    n_tiles = max(pl.cdiv(B, max_tb), min_tiles)
    TB = _round_up(pl.cdiv(B, n_tiles), 8)
    B_pad = _round_up(B, TB)
    if B_pad != B:
        x = jnp.pad(x, ((0, B_pad - B), (0, 0)))
    grid = (B_pad // TB,)

    out = pl.pallas_call(
        actor_kernel,
        out_shape=jax.ShapeDtypeStruct((B_pad, A), jnp.float32),
        grid=grid,
        in_specs=[
            pl.BlockSpec((TB, S), lambda i: (i, 0)),          # x tile (streamed)
            pl.BlockSpec((S, HIDDEN), lambda i: (0, 0)),      # w1 (bf16) resident
            pl.BlockSpec((1, HIDDEN), lambda i: (0, 0)),      # b1 resident
            pl.BlockSpec((HIDDEN, A_pad), lambda i: (0, 0)),  # w2 (padded bf16) resident
            pl.BlockSpec((1, A_pad), lambda i: (0, 0)),       # b2 (padded) resident
        ],
        out_specs=pl.BlockSpec((TB, A), lambda i: (i, 0)),    # narrow (TB, A) output
        compiler_params=pltpu.CompilerParams(
            dimension_semantics=("parallel",),                # shard tiles across TCs
            vmem_limit_bytes=vmem_limit,
        ),
    )(x, w1b, b1, w2p, b2p)

    # Strip batch padding only; the action dim is already narrow.
    return out[:B]


def init_actor_params(key, state_size, action_size):
    # Deterministic init mimicking torch.nn.Linear default: U(-1/sqrt(fan_in), +)
    k1, k2, k3, k4 = jax.random.split(key, 4)
    bound1 = 1.0 / jnp.sqrt(jnp.float32(state_size))
    bound2 = 1.0 / jnp.sqrt(jnp.float32(HIDDEN))
    w1 = jax.random.uniform(k1, (state_size, HIDDEN), jnp.float32, -bound1, bound1)
    b1 = jax.random.uniform(k2, (1, HIDDEN), jnp.float32, -bound1, bound1)
    w2 = jax.random.uniform(k3, (HIDDEN, action_size), jnp.float32, -bound2, bound2)
    b2 = jax.random.uniform(k4, (1, action_size), jnp.float32, -bound2, bound2)
    return w1, b1, w2, b2


if __name__ == "__main__":
    # CartPole-v1: state_size = 4, action_size = 2
    state_size = 4
    action_size = 2
    batch = 8

    key = jax.random.PRNGKey(0)
    kx, kp = jax.random.split(key)
    x = jax.random.normal(kx, (batch, state_size), jnp.float32)
    w1, b1, w2, b2 = init_actor_params(kp, state_size, action_size)

    out = actor_forward(x, w1, b1, w2, b2)
    out = jax.block_until_ready(out)

    # Pure-JAX f32 reference (same math as the PyTorch module).
    h_ref = jnp.maximum(x @ w1 + b1, 0.0)
    probs_ref = jax.nn.softmax(h_ref @ w2 + b2, axis=-1)

    assert out.shape == (batch, action_size)
    # bf16 MXU inputs => ~1e-2-level logit agreement; probs well within 2e-2.
    assert jnp.allclose(out, probs_ref, atol=2e-2, rtol=2e-2)
    # Exact softmax division: rows sum to 1 up to fp rounding.
    assert jnp.allclose(jnp.sum(out, axis=-1), 1.0, atol=1e-3)

    print("KERNEL_OK")
</pallas_src>

<mosaic_0001>
module attributes {stable_mosaic.version = 11 : i64} {
  func.func @actor_kernel(%arg0: i32, %arg1: memref<8x4xf32, #tpu.memory_space<vmem>>, %arg2: memref<4x128xbf16, #tpu.memory_space<vmem>>, %arg3: memref<1x128xf32, #tpu.memory_space<vmem>>, %arg4: memref<128x128xbf16, #tpu.memory_space<vmem>>, %arg5: memref<1x128xf32, #tpu.memory_space<vmem>>, %arg6: memref<8x2xf32, #tpu.memory_space<vmem>>) attributes {dimension_semantics = [#tpu.dimension_semantics<parallel>], iteration_bounds = array<i64: 1>, scalar_prefetch = 0 : i64, scratch_operands = 0 : i64, tpu.core_type = #tpu.core_type<tc>, window_params = [{transform_indices = @transform_0, window_bounds = array<i64: 8, 4>}, {pipeline_mode = #tpu.pipeline_mode<synchronous>, transform_indices = @transform_1, window_bounds = array<i64: 4, 128>}, {pipeline_mode = #tpu.pipeline_mode<synchronous>, transform_indices = @transform_2, window_bounds = array<i64: 1, 128>}, {pipeline_mode = #tpu.pipeline_mode<synchronous>, transform_indices = @transform_3, window_bounds = array<i64: 128, 128>}, {pipeline_mode = #tpu.pipeline_mode<synchronous>, transform_indices = @transform_4, window_bounds = array<i64: 1, 128>}, {transform_indices = @transform_5, window_bounds = array<i64: 8, 2>}]} {
    %c0 = arith.constant 0 : index
    %c0_0 = arith.constant 0 : index
    %0 = vector.load %arg1[%c0, %c0_0] : memref<8x4xf32, #tpu.memory_space<vmem>>, vector<8x4xf32>
    %1 = arith.truncf %0 : vector<8x4xf32> to vector<8x4xbf16>
    %c0_1 = arith.constant 0 : index
    %c0_2 = arith.constant 0 : index
    %2 = vector.load %arg2[%c0_1, %c0_2] : memref<4x128xbf16, #tpu.memory_space<vmem>>, vector<4x128xbf16>
    %cst = arith.constant dense<0.000000e+00> : vector<8x128xf32>
    %3 = tpu.matmul %1, %2, %cst {dimension_numbers = #tpu.dot_dimension_numbers<[1], [0], [0], [1], [0, 0, 1, 1], [], []>} : vector<8x4xbf16>, vector<4x128xbf16>, vector<8x128xf32> -> vector<8x128xf32>
    %c0_3 = arith.constant 0 : index
    %c0_4 = arith.constant 0 : index
    %4 = vector.load %arg3[%c0_3, %c0_4] : memref<1x128xf32, #tpu.memory_space<vmem>>, vector<1x128xf32>
    %5 = vector.broadcast %4 : vector<1x128xf32> to vector<8x128xf32>
    %6 = arith.addf %3, %5 : vector<8x128xf32>
    %cst_5 = arith.constant 0.000000e+00 : f32
    %7 = vector.broadcast %cst_5 : f32 to vector<8x128xf32>
    %8 = arith.maximumf %6, %7 : vector<8x128xf32>
    %9 = arith.truncf %8 : vector<8x128xf32> to vector<8x128xbf16>
    %c0_6 = arith.constant 0 : index
    %c0_7 = arith.constant 0 : index
    %10 = vector.load %arg4[%c0_6, %c0_7] : memref<128x128xbf16, #tpu.memory_space<vmem>>, vector<128x128xbf16>
    %cst_8 = arith.constant dense<0.000000e+00> : vector<8x128xf32>
    %11 = tpu.matmul %9, %10, %cst_8 {dimension_numbers = #tpu.dot_dimension_numbers<[1], [0], [0], [1], [0, 0, 1, 1], [], []>} : vector<8x128xbf16>, vector<128x128xbf16>, vector<8x128xf32> -> vector<8x128xf32>
    %c0_9 = arith.constant 0 : index
    %c0_10 = arith.constant 0 : index
    %12 = vector.load %arg5[%c0_9, %c0_10] : memref<1x128xf32, #tpu.memory_space<vmem>>, vector<1x128xf32>
    %13 = vector.broadcast %12 : vector<1x128xf32> to vector<8x128xf32>
    %14 = arith.addf %11, %13 : vector<8x128xf32>
    %cst_11 = arith.constant dense<0xFF800000> : vector<8xf32>
    %15 = vector.multi_reduction <maximumf>, %14, %cst_11 [1] : vector<8x128xf32> to vector<8xf32>
    %16 = vector.shape_cast %15 : vector<8xf32> to vector<8x1xf32>
    %17 = vector.broadcast %16 : vector<8x1xf32> to vector<8x128xf32>
    %18 = arith.subf %14, %17 : vector<8x128xf32>
    %19 = math.exp %18 : vector<8x128xf32>
    %cst_12 = arith.constant dense<0.000000e+00> : vector<8xf32>
    %20 = vector.multi_reduction <add>, %19, %cst_12 [1] : vector<8x128xf32> to vector<8xf32>
    %21 = vector.shape_cast %20 : vector<8xf32> to vector<8x1xf32>
    %22 = vector.broadcast %21 : vector<8x1xf32> to vector<8x128xf32>
    %23 = arith.divf %19, %22 : vector<8x128xf32>
    %24 = vector.extract_strided_slice %23 {offsets = [0, 0], sizes = [8, 2], strides = [1, 1]} : vector<8x128xf32> to vector<8x2xf32>
    %c0_13 = arith.constant 0 : index
    %c0_14 = arith.constant 0 : index
    %25 = vector.load %arg6[%c0_13, %c0_14] : memref<8x2xf32, #tpu.memory_space<vmem>>, vector<8x2xf32>
    tpu.vector_store %arg6[%c0_13, %c0_14], %24 {strides = array<i32>} : memref<8x2xf32, #tpu.memory_space<vmem>>, vector<8x2xf32>,
    return
  }
  func.func @transform_0(%arg0: i32) -> (i32, i32) {
    %c0_i32 = arith.constant 0 : i32
    %c0_i32_0 = arith.constant 0 : i32
    return %arg0, %c0_i32 : i32, i32
  }
  func.func @transform_1(%arg0: i32) -> (i32, i32) {
    %c0_i32 = arith.constant 0 : i32
    %c0_i32_0 = arith.constant 0 : i32
    %c0_i32_1 = arith.constant 0 : i32
    return %c0_i32, %c0_i32_0 : i32, i32
  }
  func.func @transform_2(%arg0: i32) -> (i32, i32) {
    %c0_i32 = arith.constant 0 : i32
    %c0_i32_0 = arith.constant 0 : i32
    %c0_i32_1 = arith.constant 0 : i32
    return %c0_i32, %c0_i32_0 : i32, i32
  }
  func.func @transform_3(%arg0: i32) -> (i32, i32) {
    %c0_i32 = arith.constant 0 : i32
    %c0_i32_0 = arith.constant 0 : i32
    %c0_i32_1 = arith.constant 0 : i32
    return %c0_i32, %c0_i32_0 : i32, i32
  }
  func.func @transform_4(%arg0: i32) -> (i32, i32) {
    %c0_i32 = arith.constant 0 : i32
    %c0_i32_0 = arith.constant 0 : i32
    %c0_i32_1 = arith.constant 0 : i32
    return %c0_i32, %c0_i32_0 : i32, i32
  }
  func.func @transform_5(%arg0: i32) -> (i32, i32) {
    %c0_i32 = arith.constant 0 : i32
    %c0_i32_0 = arith.constant 0 : i32
    return %arg0, %c0_i32 : i32, i32
  }
}

</mosaic_0001>

<bundles_post_ra>
// kernel: actor_forward.1
= control target key start
LH: loop header
LB: loop body
LE: loop exit
PB: predicated region body
PF: predicated region fallthrough
CT: control target
= control target key end

     0   :  { %vm35_vm0 = vcmask 1041408   ;;  %v269_v0 = vmov 0.0   ;;  %vm270_vm1 = vmmov 0   ;;  %vm31_vm2 = vcmask 31744   ;;  %s340_s1 = inlined_call_operand.vmem [shape: bf16[4,128], index: 1, kind: input, shape index: {}]   ;;  %s341_s0 = inlined_call_operand.vmem [shape: f32[8,4], index: 0, kind: input, shape index: {}]   ;;  %s342_s3 = inlined_call_operand.vmem [shape: bf16[128,128], index: 3, kind: input, shape index: {}]   ;;  %s343_s2 = inlined_call_operand.vmem [shape: f32[1,128], index: 2, kind: input, shape index: {}]   ;;  %s344_s4 = inlined_call_operand.vmem [shape: f32[1,128], index: 4, kind: input, shape index: {}]   ;;  %s345_s5 = inlined_call_operand.vmem [shape: f32[8,2], index: 5, kind: output, shape index: {}]  }
   0x1   :  { %229 = vmatprep.subr.bf16.mxu0 %v269_v0  ;;  %v23_v1 = vld [vmem:[%s340_s1] sm:$0x3]  ;;  %231 = vmatprep.mubr.msk.bf16.mxu0 %vm270_vm1, %v269_v0  ;;  %v257_v5 = vld [vmem:[%s342_s3 + $0x38] sm:$0xff]   ;;  %v258_v6 = vld [vmem:[%s342_s3 + $0x30] sm:$0xff]   ;;  %vm201_vm3 = vcmask 15360  }
   0x2   :  { %v21_v2 = vld [vmem:[%s341_s0] sm:$0xff]  ;;  %v37_v3 = vsel %vm35_vm0, %v23_v1, 0  ;;  %235 = vmatprep.subr.bf16.mxu1 %v269_v0  ;;  %251 = vmatprep.mubr.msk.bf16.mxu1 %vm270_vm1, %v269_v0  ;;  %v259_v7 = vld [vmem:[%s342_s3 + $0x28] sm:$0xff]   ;;  %v261_v9 = vld [vmem:[%s342_s3 + $0x18] sm:$0xff]  }
   0x3   :  { %v22_v4 = vpack.c.bf16 %v21_v2, %v21_v2  ;;  %230 = vmatpush3.bf16.msra.mxu0 %v37_v3  ;;  %236 = vmatpush3.bf16.msra.mxu1 %v257_v5  ;;  %v260_v8 = vld [vmem:[%s342_s3 + $0x20] sm:$0xff]   ;;  %v262_v10 = vld [vmem:[%s342_s3 + $0x10] sm:$0xff]   ;;  %v263_v11 = vld [vmem:[%s342_s3 + $0x8] sm:$0xff]  }
   0x4   :  { %237 = vmatprep.subr.bf16.mxu1 %v269_v0  ;;  %v264_v12 = vld [vmem:[%s342_s3] sm:$0xff]  }
   0x5   :  { %v207_v13 = vld [vmem:[%s343_s2] ss:$0 sm:$0xff] }
   0x6   :  { %232 = vmatmul.mubr.msk.bf16.vlgmr.msra.gmra.mxu0 %vm31_vm2, %v22_v4  ;;  %v209_v21 = vld [vmem:[%s344_s4] ss:$0 sm:$0xff] }
   0x7   :  { %238 = vmatpush3.bf16.msra.mxu1 %v258_v6 }
   0x8   :  { %239 = vmatprep.subr.bf16.mxu1 %v269_v0 }
   0xb   :  { %240 = vmatpush3.bf16.msra.mxu1 %v259_v7 }
   0xc   :  { %241 = vmatprep.subr.bf16.mxu1 %v269_v0 }
   0xf   :  { %242 = vmatpush3.bf16.msra.mxu1 %v260_v8 }
  0x10   :  { %243 = vmatprep.subr.bf16.mxu1 %v269_v0 }
  0x13   :  { %244 = vmatpush3.bf16.msra.mxu1 %v261_v9 }
  0x14   :  { %245 = vmatprep.subr.bf16.mxu1 %v269_v0 }
  0x17   :  { %246 = vmatpush3.bf16.msra.mxu1 %v262_v10 }
  0x18   :  { %247 = vmatprep.subr.bf16.mxu1 %v269_v0 }
  0x1b   :  { %248 = vmatpush3.bf16.msra.mxu1 %v263_v11 }
  0x1c   :  { %249 = vmatprep.subr.bf16.mxu1 %v269_v0 }
  0x1f   :  { %250 = vmatpush3.bf16.msra.mxu1 %v264_v12 }
  0xc6   :  { %v73_v14 = vpop.f32.mrf.mxu0 }
  0xc7   :  { %v74_v15 = vadd.f32 %v207_v13, %v73_v14 }
  0xc8   :  { %v233_v16 = vpop.f32.mrf.mxu0 }
  0xc9   :  { %v79_v17 = vmax.f32 %v74_v15, 0.0 }
  0xca   :  { %v76_v18 = vpop.f32.mrf.mxu0 }
  0xcb   :  { %v80_v19 = vpack.c.bf16 %v79_v17, %v79_v17 }
  0xcc   :  { %v234_v20 = vpop.f32.mrf.mxu0 }
  0xcd   :  { %252 = vmatmul.mubr.bf16.vlgmr.msra.gmra.mxu1 %v80_v19 }
 0x18d   :  { %v186_v22 = vpop.f32.mrf.mxu1 }
 0x18e   :  { %v187_v23 = vadd.f32 %v209_v21, %v186_v22 }
 0x18f   :  { %v253_v24 = vpop.f32.mrf.mxu1 }
 0x190   :  { %192 = vmax.xlane.f32.xlu0 %v187_v23 }
 0x191   :  { %v189_v25 = vpop.f32.mrf.mxu1 }
 0x193   :  { %v254_v26 = vpop.f32.mrf.mxu1 }
 0x219   :  { %v193_v27 = vpop.xlane.xlu0 %192 }
 0x21a   :  { %v194_v28 = vsub.f32 %v187_v23, %v193_v27 }
 0x21c   :  { %v195_v29 = vmul.f32 1.442695, %v194_v28 }
 0x21e   :  { %265 = vpow2.f32 %v195_v29 }
 0x22b   :  { %v266_v30 = vpop.eup %265 }
 0x22c   :  { %197 = vadd.xlane.f32.xlu0 %v266_v30 }
 0x2b5   :  { %v198_v31 = vpop.xlane.xlu0 %197 }
 0x2b6   :  { %267 = vrcp.f32 %v198_v31 }
 0x2c3   :  { %v268_v32 = vpop.eup %267 }
 0x2c4   :  { %v200_v33 = vmul.f32 %v268_v32, %v266_v30 }
 0x2c6   :  { %202 = vst.msk [vmem:[%s345_s5] sm:$0xff] %vm201_vm3, %v200_v33 }

</bundles_post_ra>
